<compile_context>
chip_gen: v7x
topology: tpu7x:2x2x1
jax: 0.10.0
libtpu: 0.0.40
codegen_flags: <defaults>
</compile_context>

<pallas_src>
import math

import jax
import jax.numpy as jnp
from jax.experimental import pallas as pl
from jax.experimental.pallas import tpu as pltpu

P_STAR = 5  # len(a) - 1, as in the reference script

# c_k = 2*k*exp(k), folded at trace time (Python float constants).
_CK = tuple(2.0 * float(k) * math.exp(float(k)) for k in range(P_STAR + 1))

# Denominator polynomial coefficients (compile-time constants):
#   D_A(e) = (1+c1 e)(1+c2 e)(1+c3 e),  D_B(e) = (1+c4 e)(1+c5 e)
_DA1 = _CK[1] + _CK[2] + _CK[3]
_DA2 = _CK[1] * _CK[2] + _CK[1] * _CK[3] + _CK[2] * _CK[3]
_DA3 = _CK[1] * _CK[2] * _CK[3]
_DB1 = _CK[4] + _CK[5]
_DB2 = _CK[4] * _CK[5]

# Clamp on e = exp(-(x+3)) so dA3 * e^3 stays finite in f32.
_E_MAX = 1e10


def predictor_kernel(coef_ref, x_ref, o_ref):
    # coef_ref: SMEM (6,) f32 = [theta0, nA0, nA1, nA2, nB0, nB1]
    # x_ref / o_ref: VMEM tiles of shape (tm, tn)

    # Hoist all SMEM scalar reads off the vector critical path.
    t0 = coef_ref[0]
    na0 = coef_ref[1]
    na1 = coef_ref[2]
    na2 = coef_ref[3]
    nb0 = coef_ref[4]
    nb1 = coef_ref[5]

    x = x_ref[...]
    # Single shared exponential for all k (exp(-(x-k+3)) == exp(-(x+3))*exp(k)).
    e = jnp.exp(-(x + 3.0))
    e = jnp.minimum(e, _E_MAX)  # keep grouped denominators finite in f32

    # Group k in {1,2,3}: one divide.  Group k in {4,5}: one divide.
    num_a = na0 + e * (na1 + e * na2)
    den_a = 1.0 + e * (_DA1 + e * (_DA2 + e * _DA3))
    num_b = nb0 + e * nb1
    den_b = 1.0 + e * (_DB1 + e * _DB2)

    o_ref[...] = t0 + num_a / den_a + num_b / den_b


def _round_up(a, b):
    return ((a + b - 1) // b) * b


def _grouped_coefs(theta):
    """Fold theta into the grouped-numerator coefficients (6 scalars, SMEM)."""
    t = theta.astype(jnp.float32)
    c = _CK
    return jnp.stack(
        [
            t[0],
            t[1] + t[2] + t[3],
            t[1] * (c[2] + c[3]) + t[2] * (c[1] + c[3]) + t[3] * (c[1] + c[2]),
            t[1] * (c[2] * c[3]) + t[2] * (c[1] * c[3]) + t[3] * (c[1] * c[2]),
            t[4] + t[5],
            t[4] * c[5] + t[5] * c[4],
        ]
    )


def _predictor_2d(x2d, coef, tm):
    rows, tn = x2d.shape
    grid = pl.cdiv(rows, tm)
    n = rows * tn
    cost = pl.CostEstimate(
        flops=20 * n,            # Horner evals + adds on the VPU
        transcendentals=3 * n,   # 1 exp + 2 f32 divides per element
        bytes_accessed=8 * n,    # 4 B in + 4 B out per element
    )
    return pl.pallas_call(
        predictor_kernel,
        out_shape=jax.ShapeDtypeStruct((rows, tn), x2d.dtype),
        grid=(grid,),
        in_specs=[
            pl.BlockSpec(memory_space=pltpu.SMEM),     # grouped coefficients
            pl.BlockSpec((tm, tn), lambda i: (i, 0)),  # x tile
        ],
        out_specs=pl.BlockSpec((tm, tn), lambda i: (i, 0)),
        compiler_params=pltpu.CompilerParams(
            dimension_semantics=("parallel",),         # shards rows across TCs on v7x
            vmem_limit_bytes=32 * 1024 * 1024,
        ),
        cost_estimate=cost,
    )(coef, x2d)


def predictor(x, theta):
    """Elementwise Predictor forward on an arbitrarily shaped array."""
    orig_shape = x.shape
    if x.dtype != jnp.float32:
        x = x.astype(jnp.float32)
    n = x.size
    if n == 0:
        return jnp.zeros(orig_shape, dtype=x.dtype)

    x_flat = x.reshape(-1)          # free (contiguous) reshape
    coef = _grouped_coefs(theta)

    # Lane width: largest of {1024,512,256,128} that divides n -> no pad copy.
    tn = next((c for c in (1024, 512, 256, 128) if n % c == 0), 0)

    if tn:
        x2d = x_flat.reshape(n // tn, tn)
        padded = 0
    else:
        # Rare fallback: n not a multiple of 128 -> pad to one lane multiple.
        tn = 128
        n_pad = _round_up(n, tn)
        x2d = jnp.pad(x_flat, (0, n_pad - n)).reshape(n_pad // tn, tn)
        padded = n_pad - n

    rows = x2d.shape[0]
    if rows <= 8:
        tm = rows  # single full-extent block (allowed even if not 8-aligned)
    else:
        # ~2 MiB blocks for large inputs, at least 2 grid steps for megacore,
        # sublane dim a multiple of 8; ragged last block is masked by Pallas.
        target_rows = max(8, (2 * 1024 * 1024) // (4 * tn))
        tm = min(target_rows, _round_up(pl.cdiv(rows, 2), 8))

    out2d = _predictor_2d(x2d, coef, tm)

    if padded:
        return out2d.reshape(-1)[:n].reshape(orig_shape)
    return out2d.reshape(orig_shape)


def predictor_ref(x, theta):
    # Pure-JAX reference matching the PyTorch forward exactly (un-factored).
    result = jnp.zeros_like(x)
    for k in range(P_STAR + 1):
        result = result + theta[k] / (1.0 + 2.0 * k * jnp.exp(-(x - k + 3.0)))
    return result


if __name__ == "__main__":
    key = jax.random.PRNGKey(0)
    k_theta, k_x1, k_x2, k_x3 = jax.random.split(key, 4)

    # Deterministic parameter init, same distribution as the module:
    # np.random.uniform(-100, 100, size=p_star + 1)
    theta = jax.random.uniform(
        k_theta, (P_STAR + 1,), dtype=jnp.float32, minval=-100.0, maxval=100.0)

    # Main small input consistent with the elementwise forward.
    x = jax.random.normal(k_x1, (16, 256), dtype=jnp.float32)
    out = jax.block_until_ready(predictor(x, theta))
    ref = predictor_ref(x, theta)
    assert jnp.allclose(out, ref, rtol=1e-5, atol=1e-3), "mismatch vs reference"
    assert out.shape == x.shape and out.dtype == x.dtype

    # Ragged-grid path (rows not a multiple of tm -> masked boundary block).
    x_ragged = 3.0 * jax.random.normal(k_x2, (27, 128), dtype=jnp.float32)
    out_r = jax.block_until_ready(predictor(x_ragged, theta))
    assert jnp.allclose(out_r, predictor_ref(x_ragged, theta),
                        rtol=1e-5, atol=1e-3), "mismatch (ragged grid)"

    # Fallback pad path (n not a multiple of 128).
    x_odd = jax.random.normal(k_x3, (7, 13), dtype=jnp.float32)
    out_o = jax.block_until_ready(predictor(x_odd, theta))
    assert jnp.allclose(out_o, predictor_ref(x_odd, theta),
                        rtol=1e-5, atol=1e-3), "mismatch (pad fallback)"

    print("KERNEL_OK")
</pallas_src>

<mosaic_0001>
module attributes {stable_mosaic.version = 11 : i64} {
  func.func @predictor_kernel(%arg0: i32, %arg1: memref<6xf32, #tpu.memory_space<smem>>, %arg2: memref<4x1024xf32, #tpu.memory_space<vmem>>, %arg3: memref<4x1024xf32, #tpu.memory_space<vmem>>) attributes {dimension_semantics = [#tpu.dimension_semantics<parallel>], iteration_bounds = array<i64: 1>, scalar_prefetch = 0 : i64, scratch_operands = 0 : i64, tpu.core_type = #tpu.core_type<tc>, window_params = [{transform_indices = @transform_0, window_bounds = array<i64: 6>}, {transform_indices = @transform_1, window_bounds = array<i64: 4, 1024>}, {transform_indices = @transform_2, window_bounds = array<i64: 4, 1024>}]} {
    %c0 = arith.constant 0 : index
    %0 = memref.load %arg1[%c0] : memref<6xf32, #tpu.memory_space<smem>>
    %c1 = arith.constant 1 : index
    %1 = memref.load %arg1[%c1] : memref<6xf32, #tpu.memory_space<smem>>
    %c2 = arith.constant 2 : index
    %2 = memref.load %arg1[%c2] : memref<6xf32, #tpu.memory_space<smem>>
    %c3 = arith.constant 3 : index
    %3 = memref.load %arg1[%c3] : memref<6xf32, #tpu.memory_space<smem>>
    %c4 = arith.constant 4 : index
    %4 = memref.load %arg1[%c4] : memref<6xf32, #tpu.memory_space<smem>>
    %c5 = arith.constant 5 : index
    %5 = memref.load %arg1[%c5] : memref<6xf32, #tpu.memory_space<smem>>
    %c0_0 = arith.constant 0 : index
    %c0_1 = arith.constant 0 : index
    %6 = vector.load %arg2[%c0_0, %c0_1] : memref<4x1024xf32, #tpu.memory_space<vmem>>, vector<4x1024xf32>
    %cst = arith.constant 3.000000e+00 : f32
    %7 = vector.broadcast %cst : f32 to vector<4x1024xf32>
    %8 = arith.addf %6, %7 : vector<4x1024xf32>
    %cst_2 = arith.constant 0.000000e+00 : f32
    %9 = vector.broadcast %cst_2 : f32 to vector<4x1024xf32>
    %10 = arith.subf %9, %8 : vector<4x1024xf32>
    %11 = math.exp %10 : vector<4x1024xf32>
    %cst_3 = arith.constant 1.000000e+10 : f32
    %12 = vector.broadcast %cst_3 : f32 to vector<4x1024xf32>
    %13 = arith.minimumf %11, %12 : vector<4x1024xf32>
    %14 = vector.broadcast %3 : f32 to vector<4x1024xf32>
    %15 = arith.mulf %13, %14 : vector<4x1024xf32>
    %16 = vector.broadcast %2 : f32 to vector<4x1024xf32>
    %17 = arith.addf %16, %15 : vector<4x1024xf32>
    %18 = arith.mulf %13, %17 : vector<4x1024xf32>
    %19 = vector.broadcast %1 : f32 to vector<4x1024xf32>
    %20 = arith.addf %19, %18 : vector<4x1024xf32>
    %cst_4 = arith.constant 19364.582 : f32
    %21 = vector.broadcast %cst_4 : f32 to vector<4x1024xf32>
    %22 = arith.mulf %13, %21 : vector<4x1024xf32>
    %cst_5 = arith.constant 4377.77783 : f32
    %23 = vector.broadcast %cst_5 : f32 to vector<4x1024xf32>
    %24 = arith.addf %23, %22 : vector<4x1024xf32>
    %25 = arith.mulf %13, %24 : vector<4x1024xf32>
    %cst_6 = arith.constant 155.506012 : f32
    %26 = vector.broadcast %cst_6 : f32 to vector<4x1024xf32>
    %27 = arith.addf %26, %25 : vector<4x1024xf32>
    %28 = arith.mulf %13, %27 : vector<4x1024xf32>
    %cst_7 = arith.constant 1.000000e+00 : f32
    %29 = vector.broadcast %cst_7 : f32 to vector<4x1024xf32>
    %30 = arith.addf %29, %28 : vector<4x1024xf32>
    %31 = vector.broadcast %5 : f32 to vector<4x1024xf32>
    %32 = arith.mulf %13, %31 : vector<4x1024xf32>
    %33 = vector.broadcast %4 : f32 to vector<4x1024xf32>
    %34 = arith.addf %33, %32 : vector<4x1024xf32>
    %cst_8 = arith.constant 648246.688 : f32
    %35 = vector.broadcast %cst_8 : f32 to vector<4x1024xf32>
    %36 = arith.mulf %13, %35 : vector<4x1024xf32>
    %cst_9 = arith.constant 1920.91675 : f32
    %37 = vector.broadcast %cst_9 : f32 to vector<4x1024xf32>
    %38 = arith.addf %37, %36 : vector<4x1024xf32>
    %39 = arith.mulf %13, %38 : vector<4x1024xf32>
    %cst_10 = arith.constant 1.000000e+00 : f32
    %40 = vector.broadcast %cst_10 : f32 to vector<4x1024xf32>
    %41 = arith.addf %40, %39 : vector<4x1024xf32>
    %42 = arith.divf %20, %30 : vector<4x1024xf32>
    %43 = vector.broadcast %0 : f32 to vector<4x1024xf32>
    %44 = arith.addf %43, %42 : vector<4x1024xf32>
    %45 = arith.divf %34, %41 : vector<4x1024xf32>
    %46 = arith.addf %44, %45 : vector<4x1024xf32>
    %c0_11 = arith.constant 0 : index
    %c0_12 = arith.constant 0 : index
    %47 = vector.load %arg3[%c0_11, %c0_12] : memref<4x1024xf32, #tpu.memory_space<vmem>>, vector<4x1024xf32>
    tpu.vector_store %arg3[%c0_11, %c0_12], %46 {strides = array<i32>} : memref<4x1024xf32, #tpu.memory_space<vmem>>, vector<4x1024xf32>,
    return
  }
  func.func @transform_0(%arg0: i32) -> i32 {
    %c0_i32 = arith.constant 0 : i32
    %c0_i32_0 = arith.constant 0 : i32
    return %c0_i32 : i32
  }
  func.func @transform_1(%arg0: i32) -> (i32, i32) {
    %c0_i32 = arith.constant 0 : i32
    %c0_i32_0 = arith.constant 0 : i32
    return %arg0, %c0_i32 : i32, i32
  }
  func.func @transform_2(%arg0: i32) -> (i32, i32) {
    %c0_i32 = arith.constant 0 : i32
    %c0_i32_0 = arith.constant 0 : i32
    return %arg0, %c0_i32 : i32, i32
  }
}

</mosaic_0001>

<bundles_post_ra>
// kernel: tpu_custom_call.1
= control target key start
LH: loop header
LB: loop body
LE: loop exit
PB: predicated region body
PF: predicated region fallthrough
CT: control target
= control target key end

     0   :  { %7 = vsyncpa [#allocation5], 0  ;;  %s351_s0 = inlined_call_operand.hbm [shape: f32[6], index: 0, kind: input, shape index: {}]   ;;  %s352_s1 = inlined_call_operand.hbm [shape: f32[4,1024], index: 1, kind: input, shape index: {}]   ;;  %s353_s2 = inlined_call_operand.hbm [shape: f32[4,1024], index: 2, kind: output, shape index: {}]  }
   0x1   :  { %8 = vsyncpa [#allocation3], 0 }
   0x2   :  { %9 = vsyncpa [#allocation4], 0  ;;  %s211_s11 = scalar_lea.hbm %s351_s0, 16 }
   0x3   :  { %p212_p0 = scmp.ne.s32.totalorder %s351_s0, %s211_s11  ;;  %p215_p1 = scmp.lt.u32.totalorder %s211_s11, %s351_s0 }
   0x5   :  { %p217_p2 = pnand %p215_p1, %p212_p0 }
   0x7   :  { %220 = shalt.err (!%p217_p2)
}
   0x8   :  { %s271_s16 = smov [#allocation2]   ;;  %s272_s19 = smov [#allocation6]  }
   0x9   :  { %17 = dma.hbm_to_smem %s351_s0, 16, %s271_s16, [#allocation5]  }
   0xa   :  { %s24_s20 = sshll.u32 %s272_s19, 4  ;;  %s221_s23 = scalar_lea.hbm %s352_s1, 512  ;;  %s25_s20 = int_to_ptr.vmem [resolvable:$true] %s24_s20 }
   0xb   :  { %p222_p3 = scmp.ne.s32.totalorder %s352_s1, %s221_s23  ;;  %p225_p4 = scmp.lt.u32.totalorder %s221_s23, %s352_s1 }
   0xd   :  { %p227_p5 = pnand %p225_p4, %p222_p3 }
   0xf   :  { %230 = shalt.err (!%p227_p5)
}
  0x10   :  { %s231_s28 = scalar_lea.vmem %s25_s20, 512  ;;  %p236_p7 = scmp.lt.s32.totalorder %s25_s20, %s25_s20 }
  0x11   :  { %p232_p6 = scmp.ne.s32.totalorder %s25_s20, %s231_s28  ;;  %p237_p8 = scmp.lt.s32.totalorder %s231_s28, %s231_s28 }
  0x13   :  { %p238_p9 = por %p237_p8, %p236_p7 }
  0x15   :  { %p239_p10 = pnand %p238_p9, %p232_p6 }
  0x17   :  { %242 = shalt.err (!%p239_p10)
}
  0x18   :  { %27 = dma.hbm_to_vmem [thread:$0]  %s352_s1, 512, %s25_s20, [#allocation3]  }
  0x19   :  { %265 = dma.done.wait [#allocation5], 16  }
  0x1a   :  { %266 = vsyncadd [#allocation5], 4294967280 }
  0x1b   :  { %267 = dma.done.wait [#allocation3], 512  }
  0x1c   :  { %268 = vsyncadd [#allocation3], 4294966784 }
  0x1d   :  { %34 = sfence }
  0x1e   :  { %v41_v0 = vld [vmem:[#allocation6] sm:$0xff]  ;;  %v42_v1 = vld [vmem:[#allocation6 + $0x8] sm:$0xff]  ;;  %v43_v4 = vld [vmem:[#allocation6 + $0x10] sm:$0xff]  ;;  %s181_s1 = sld [smem:[#allocation2 + $0x3]]  ;;  %s180_s30 = sld [smem:[#allocation2 + $0x2]] }
  0x1f   :  { %v45_v2 = vadd.f32 3.0, %v41_v0  ;;  %v46_v3 = vadd.f32 3.0, %v42_v1  ;;  %v44_v5 = vld [vmem:[#allocation6 + $0x18] sm:$0xff]  ;;  %v47_v8 = vadd.f32 3.0, %v43_v4  ;;  %s183_s3 = sld [smem:[#allocation2 + $0x5]]  ;;  %s315_s4 = sld [smem:[#allocation2 + $0x1]] }
  0x20   :  { %v48_v9 = vadd.f32 3.0, %v44_v5  ;;  %s182_s5 = sld [smem:[#allocation2 + $0x4]]  ;;  %s324_s6 = sld [smem:[#allocation2]] }
  0x21   :  { %v49_v6 = vsub.f32 0.0, %v45_v2  ;;  %v50_v7 = vsub.f32 0.0, %v46_v3  ;;  %v51_v12 = vsub.f32 0.0, %v47_v8  ;;  %s273_s7 = smov [#allocation7]  }
  0x22   :  { %v52_v13 = vsub.f32 0.0, %v48_v9  ;;  %s169_s8 = sshll.u32 %s273_s7, 4  ;;  %s170_s8 = int_to_ptr.vmem [resolvable:$true] %s169_s8 }
  0x23   :  { %v53_v10 = vmul.f32 1.442695, %v49_v6  ;;  %v55_v11 = vmul.f32 1.442695, %v50_v7  ;;  %v57_v14 = vmul.f32 1.442695, %v51_v12  ;;  %p248_p12 = scmp.lt.s32.totalorder %s170_s8, %s170_s8 }
  0x24   :  { %v59_v15 = vmul.f32 1.442695, %v52_v13  ;;  %v65_v28 = vstv %s181_s1  ;;  %v70_v40 = vstv %s180_s30  ;;  %s243_s9 = scalar_lea.vmem %s170_s8, 512 }
  0x25   :  { %187 = vpow2.f32 %v53_v10  ;;  %v108_v51 = vstv %s183_s3  ;;  %v79_v60 = vstv %s315_s4  ;;  %p244_p11 = scmp.ne.s32.totalorder %s170_s8, %s243_s9  ;;  %p249_p13 = scmp.lt.s32.totalorder %s243_s9, %s243_s9 }
  0x26   :  { %189 = vpow2.f32 %v55_v11  ;;  %v113_v4 = vstv %s182_s5 }
  0x27   :  { %191 = vpow2.f32 %v57_v14  ;;  %p250_p0 = por %p249_p13, %p248_p12 }
  0x28   :  { %193 = vpow2.f32 %v59_v15 }
  0x29   :  { %p251_p1 = pnand %p250_p0, %p244_p11 }
  0x2f   :  { %v188_v16 = vpop.eup %187 }
  0x30   :  { %v190_v17 = vpop.eup %189  ;;  %v61_v18 = vmin.f32 %v188_v16, 1e+10 }
  0x31   :  { %v62_v19 = vmin.f32 %v190_v17, 1e+10  ;;  %v192_v22 = vpop.eup %191 }
  0x32   :  { %v84_v20 = vmul.f32 19364.582, %v61_v18  ;;  %v118_v21 = vmul.f32 648246.7, %v61_v18  ;;  %v194_v27 = vpop.eup %193  ;;  %v313_v33 = vmin.f32 %v192_v22, 1e+10  ;;  %v66_v36 = vmul.f32 %v65_v28, %v61_v18 }
  0x33   :  { %v85_v23 = vmul.f32 19364.582, %v62_v19  ;;  %v119_v24 = vmul.f32 648246.7, %v62_v19  ;;  %v317_v39 = vmin.f32 %v194_v27, 1e+10  ;;  %v67_v45 = vmul.f32 %v65_v28, %v62_v19 }
  0x34   :  { %v88_v25 = vadd.f32 4377.778, %v84_v20  ;;  %v122_v26 = vadd.f32 1920.9167, %v118_v21  ;;  %v86_v43 = vmul.f32 19364.582, %v313_v33  ;;  %v71_v49 = vadd.f32 %v70_v40, %v66_v36 }
  0x35   :  { %v89_v29 = vadd.f32 4377.778, %v85_v23  ;;  %v123_v30 = vadd.f32 1920.9167, %v119_v24  ;;  %v120_v48 = vmul.f32 648246.7, %v313_v33  ;;  %v72_v56 = vadd.f32 %v70_v40, %v67_v45 }
  0x36   :  { %v92_v31 = vmul.f32 %v88_v25, %v61_v18  ;;  %v126_v32 = vmul.f32 %v122_v26, %v61_v18  ;;  %v90_v47 = vadd.f32 4377.778, %v86_v43  ;;  %v87_v55 = vmul.f32 19364.582, %v317_v39 }
  0x37   :  { %v93_v34 = vmul.f32 %v89_v29, %v62_v19  ;;  %v127_v35 = vmul.f32 %v123_v30, %v62_v19  ;;  %v124_v54 = vadd.f32 1920.9167, %v120_v48  ;;  %v109_v61 = vmul.f32 %v108_v51, %v61_v18 }
  0x38   :  { %v96_v37 = vadd.f32 155.50601, %v92_v31  ;;  %v130_v38 = vadd.f32 1.0, %v126_v32  ;;  %v94_v53 = vmul.f32 %v90_v47, %v313_v33  ;;  %v91_v59 = vadd.f32 4377.778, %v87_v55 }
  0x39   :  { %v97_v41 = vadd.f32 155.50601, %v93_v34  ;;  %v131_v42 = vadd.f32 1.0, %v127_v35  ;;  %v128_v58 = vmul.f32 %v124_v54, %v313_v33  ;;  %v68_v62 = vmul.f32 %v65_v28, %v313_v33 }
  0x3a   :  { %v100_v44 = vmul.f32 %v96_v37, %v61_v18  ;;  %195 = vrcp.f32 %v130_v38  ;;  %v98_v57 = vadd.f32 155.50601, %v94_v53  ;;  %v121_v63 = vmul.f32 648246.7, %v317_v39 }
  0x3b   :  { %v101_v46 = vmul.f32 %v97_v41, %v62_v19  ;;  %197 = vrcp.f32 %v131_v42  ;;  %v75_v0 = vmul.f32 %v71_v49, %v61_v18  ;;  %v132_v2 = vadd.f32 1.0, %v128_v58 }
  0x3c   :  { %v104_v50 = vadd.f32 1.0, %v100_v44  ;;  %v102_v1 = vmul.f32 %v98_v57, %v313_v33  ;;  %v95_v3 = vmul.f32 %v91_v59, %v317_v39  ;;  %v76_v5 = vmul.f32 %v72_v56, %v62_v19 }
  0x3d   :  { %v105_v52 = vadd.f32 1.0, %v101_v46  ;;  %v110_v6 = vmul.f32 %v108_v51, %v62_v19  ;;  %v125_v7 = vadd.f32 1920.9167, %v121_v63  ;;  %v73_v10 = vadd.f32 %v70_v40, %v68_v62 }
  0x3e   :  { %199 = vrcp.f32 %v104_v50  ;;  %v106_v8 = vadd.f32 1.0, %v102_v1  ;;  %v99_v9 = vadd.f32 155.50601, %v95_v3  ;;  %v69_v11 = vmul.f32 %v65_v28, %v317_v39 }
  0x3f   :  { %201 = vrcp.f32 %v105_v52  ;;  %v129_v12 = vmul.f32 %v125_v7, %v317_v39  ;;  %v80_v14 = vadd.f32 %v79_v60, %v75_v0  ;;  %v114_v15 = vadd.f32 %v113_v4, %v109_v61 }
  0x40   :  { %203 = vrcp.f32 %v132_v2  ;;  %v103_v16 = vmul.f32 %v99_v9, %v317_v39  ;;  %v81_v18 = vadd.f32 %v79_v60, %v76_v5  ;;  %v115_v20 = vadd.f32 %v113_v4, %v110_v6 }
  0x41   :  { %205 = vrcp.f32 %v106_v8  ;;  %v133_v19 = vadd.f32 1.0, %v129_v12  ;;  %v111_v21 = vmul.f32 %v108_v51, %v313_v33  ;;  %v142_v24 = vstv %s324_s6 }
  0x42   :  { %v107_v22 = vadd.f32 1.0, %v103_v16  ;;  %v77_v25 = vmul.f32 %v73_v10, %v313_v33  ;;  %v74_v26 = vadd.f32 %v70_v40, %v69_v11  ;;  %v112_v38 = vmul.f32 %v108_v51, %v317_v39 }
  0x43   :  { %207 = vrcp.f32 %v133_v19  ;;  %v116_v34 = vadd.f32 %v113_v4, %v111_v21 }
  0x44   :  { %v196_v13 = vpop.eup %195  ;;  %209 = vrcp.f32 %v107_v22  ;;  %v82_v36 = vadd.f32 %v79_v60, %v77_v25  ;;  %v78_v37 = vmul.f32 %v74_v26, %v317_v39  ;;  %v117_v46 = vadd.f32 %v113_v4, %v112_v38 }
  0x45   :  { %v198_v17 = vpop.eup %197  ;;  %v148_v29 = vmul.f32 %v196_v13, %v114_v15 }
  0x46   :  { %v150_v31 = vmul.f32 %v198_v17, %v115_v20  ;;  %v83_v45 = vadd.f32 %v79_v60, %v78_v37 }
  0x48   :  { %v200_v23 = vpop.eup %199 }
  0x49   :  { %v202_v27 = vpop.eup %201  ;;  %v135_v28 = vmul.f32 %v200_v23, %v80_v14 }
  0x4a   :  { %v137_v30 = vmul.f32 %v202_v27, %v81_v18  ;;  %v204_v41 = vpop.eup %203 }
  0x4b   :  { %v143_v32 = vadd.f32 %v142_v24, %v135_v28  ;;  %v206_v33 = vpop.eup %205  ;;  %v152_v44 = vmul.f32 %v204_v41, %v116_v34 }
  0x4c   :  { %v144_v35 = vadd.f32 %v142_v24, %v137_v30  ;;  %v139_v40 = vmul.f32 %v206_v33, %v82_v36 }
  0x4d   :  { %v155_v42 = vadd.f32 %v148_v29, %v143_v32  ;;  %v208_v47 = vpop.eup %207 }
  0x4e   :  { %v156_v43 = vadd.f32 %v150_v31, %v144_v35  ;;  %v145_v48 = vadd.f32 %v142_v24, %v139_v40  ;;  %v210_v49 = vpop.eup %209  ;;  %v154_v53 = vmul.f32 %v208_v47, %v117_v46 }
  0x4f   :  { %159 = vst [vmem:[#allocation7] sm:$0xff] %v155_v42  ;;  %v141_v52 = vmul.f32 %v210_v49, %v83_v45 }
  0x50   :  { %160 = vst [vmem:[#allocation7 + $0x8] sm:$0xff] %v156_v43  ;;  %v157_v50 = vadd.f32 %v152_v44, %v145_v48 }
  0x51   :  { %v146_v39 = vadd.f32 %v142_v24, %v141_v52 }
  0x52   :  { %161 = vst [vmem:[#allocation7 + $0x10] sm:$0xff] %v157_v50 }
  0x53   :  { %v158_v51 = vadd.f32 %v154_v53, %v146_v39 }
  0x55   :  { %162 = vst [vmem:[#allocation7 + $0x18] sm:$0xff] %v158_v51 }
  0x56   :  { %254 = shalt.err (!%p251_p1)
}
  0x57   :  { %s255_s12 = scalar_lea.hbm %s353_s2, 512 }
  0x58   :  { %p256_p2 = scmp.ne.s32.totalorder %s353_s2, %s255_s12  ;;  %p259_p3 = scmp.lt.u32.totalorder %s255_s12, %s353_s2 }
  0x5a   :  { %p261_p4 = pnand %p259_p3, %p256_p2 }
  0x5c   :  { %264 = shalt.err (!%p261_p4)
}
  0x5d   :  { %172 = dma.vmem_to_hbm [thread:$0]  %s170_s8, 512, %s353_s2, [#allocation4]  }
  0x5e   :  { %269 = dma.done.wait [#allocation4], 512  }
  0x5f   :  { %270 = vsyncadd [#allocation4], 4294966784 }
  0x60   :  { %176 = vsyncpa [#allocation3], 1 }
  0x61   :  { %177 = vsyncpa [#allocation4], 1 }
  0x62   :  { %178 = vsyncpa [#allocation5], 1 }

</bundles_post_ra>
